<compile_context>
chip_gen: v7x
topology: tpu7x:2x2x1
jax: 0.10.0
libtpu: 0.0.40
codegen_flags: <defaults>
</compile_context>

<pallas_src>
import jax
import jax.numpy as jnp
from jax.experimental import pallas as pl
from jax.experimental.pallas import tpu as pltpu

_MIB = 1024 * 1024


def _round_up(x, m):
    return ((x + m - 1) // m) * m


def _instrumented_kernel(x_ref, w1t_ref, w2t_ref, prm_ref, retained_ref, y_ref):
    # x block: (Cp, THW) -- channels on sublanes, spatial on lanes (lane-dense).
    x = x_ref[...]

    # conv1 (1x1) as a channel matmul in transposed orientation:
    #   h^T = w1^T @ x^T ; f32 accumulation on the MXU.
    h = jnp.dot(w1t_ref[...], x, preferred_element_type=jnp.float32)

    prm = prm_ref[...]                        # (Cp, 4) f32 resident params
    b1 = prm[:, 0:1]                          # conv1 bias        (per channel)
    b2 = prm[:, 1:2]                          # conv2 bias
    scale = prm[:, 2:3]                       # 1 - ablation
    shift = prm[:, 3:4]                       # replacement * ablation

    h = h + b1                                # (Cp, 1) broadcast over lanes

    # retain_layer('conv1'): PRE-edit activation written straight from the
    # f32 accumulator (no extra VMEM copy, no HBM round trip).
    retained_ref[...] = h.astype(retained_ref.dtype)

    # edit_layer: apply_ablation_replacement, folded to one fused mul-add.
    h = h * scale + shift

    # ReLU then conv2 (1x1) on the MXU; single cast at the store.
    h = jnp.maximum(h, 0.0)
    y = jnp.dot(w2t_ref[...], h.astype(w2t_ref.dtype),
                preferred_element_type=jnp.float32)
    y_ref[...] = (y + b2).astype(y_ref.dtype)


def _pick_tile_hw(hw, cp, n_batch, tile_hw, itemsize, vmem_budget=40 * _MIB):
    """Largest lane tile that fits the VMEM budget and gives >= 4 grid steps."""
    hw128 = _round_up(hw, 128)
    tile = min(_round_up(tile_hw, 128), hw128)

    def footprint(t):
        io = 2 * (1 + 2) * cp * t * itemsize              # x + 2 outs, 2 bufs each
        wts = 2 * (2 * cp * cp * itemsize + cp * 4 * 4)   # resident weights/params
        return io + wts

    # Keep the double-buffered working set inside the (v7x-safe) VMEM budget.
    while tile > 128 and footprint(tile) > vmem_budget:
        tile = max(128, (tile // 2 // 128) * 128)
    # v7x has 2 TensorCores: keep enough grid steps to split the parallel axes.
    while tile > 128 and n_batch * pl.cdiv(hw128, tile) < 4:
        tile = max(128, (tile // 2 // 128) * 128)
    return tile, footprint(tile)


def instrumented_forward(x, w1, b1, w2, b2, ablation, replacement, *,
                         tile_hw=2048):
    """Fused conv1 -> retain -> ablation/replacement edit -> ReLU -> conv2.

    x:  (N, C, H, W) NCHW activations
    w1: (C, C), b1: (C,)   1x1 conv1 (channel matmul: h = x @ w1 + b1)
    w2: (C, C), b2: (C,)   1x1 conv2
    ablation, replacement: (C,) per-channel edit vectors

    Returns (y_NCHW, retained_NCHW); retained is the PRE-edit conv1 output.
    """
    N, C, H, W = x.shape
    HW = H * W
    dtype = x.dtype
    itemsize = jnp.dtype(dtype).itemsize

    # Channel padding only to the sublane granule (8 f32 / 16 bf16), not 128.
    sub = max(8, 32 // max(itemsize, 1))
    cp = _round_up(C, sub)

    tile, footprint = _pick_tile_hw(HW, cp, N, tile_hw, itemsize)
    hw_p = _round_up(HW, tile)

    # NCHW -> (N, C, HW) is a free view (no transpose); pad only when needed.
    xf = x.reshape(N, C, HW)
    if cp != C or hw_p != HW:
        xf = jnp.pad(xf, ((0, 0), (0, cp - C), (0, hw_p - HW)))

    def pad_mat_t(w):          # (C_in, C_out) -> transposed + padded (cp, cp)
        return jnp.pad(w.T.astype(dtype), ((0, cp - C), (0, cp - C)))

    def col(v):                # per-channel vector -> padded (cp, 1) f32 column
        return jnp.pad(v.astype(jnp.float32), (0, cp - C)).reshape(cp, 1)

    w1t, w2t = pad_mat_t(w1), pad_mat_t(w2)
    a32 = ablation.astype(jnp.float32)
    # One resident (cp, 4) slab: [b1, b2, 1 - ablation, replacement * ablation].
    prm = jnp.concatenate(
        [col(b1), col(b2), col(1.0 - a32),
         col(replacement.astype(jnp.float32) * a32)], axis=1)

    grid = (N, hw_p // tile)
    io_spec = pl.BlockSpec((None, cp, tile), lambda n, j: (n, 0, j))  # tiled
    mat_spec = pl.BlockSpec((cp, cp), lambda n, j: (0, 0))            # resident
    prm_spec = pl.BlockSpec((cp, 4), lambda n, j: (0, 0))             # resident

    vmem_limit = max(32 * _MIB, min(48 * _MIB, int(footprint) + 8 * _MIB))

    retained_p, y_p = pl.pallas_call(
        _instrumented_kernel,
        out_shape=(jax.ShapeDtypeStruct((N, cp, hw_p), dtype),   # retained
                   jax.ShapeDtypeStruct((N, cp, hw_p), dtype)),  # y
        grid=grid,
        in_specs=[io_spec, mat_spec, mat_spec, prm_spec],
        out_specs=(io_spec, io_spec),
        compiler_params=pltpu.CompilerParams(
            dimension_semantics=("parallel", "parallel"),
            vmem_limit_bytes=vmem_limit),
    )(xf, w1t, w2t, prm)

    def unflatten(t):
        return t[:, :C, :HW].reshape(N, C, H, W)

    return unflatten(y_p), unflatten(retained_p)


if __name__ == "__main__":
    key = jax.random.PRNGKey(0)
    kx, k1, kb1, k2, kb2, kr = jax.random.split(key, 6)
    N, C, H, W = 2, 4, 16, 16

    x = jax.random.normal(kx, (N, C, H, W), jnp.float32)
    w1 = jax.random.normal(k1, (C, C), jnp.float32) * 0.5
    b1 = jax.random.normal(kb1, (C,), jnp.float32) * 0.1
    w2 = jax.random.normal(k2, (C, C), jnp.float32) * 0.5
    b2 = jax.random.normal(kb2, (C,), jnp.float32) * 0.1
    ablation = jnp.array([0.0, 0.5, 1.0, 0.25], jnp.float32)
    replacement = jax.random.normal(kr, (C,), jnp.float32)

    y, retained = jax.jit(instrumented_forward)(
        x, w1, b1, w2, b2, ablation, replacement)
    jax.block_until_ready((y, retained))

    # Pure-JAX reference of the instrumented forward (hook semantics).
    def ref(x):
        xf = jnp.transpose(x, (0, 2, 3, 1))            # NHWC
        h = xf @ w1 + b1                               # conv1 (1x1)
        ret = h                                        # pre-edit retain
        h = h * (1.0 - ablation) + replacement * ablation
        yy = jnp.maximum(h, 0.0) @ w2 + b2             # ReLU + conv2 (1x1)
        to_nchw = lambda t: jnp.transpose(t, (0, 3, 1, 2))
        return to_nchw(yy), to_nchw(ret)

    y_ref, retained_ref = ref(x)
    assert jnp.allclose(y, y_ref, atol=1e-4, rtol=1e-4), "y mismatch"
    assert jnp.allclose(retained, retained_ref, atol=1e-4, rtol=1e-4), "retained mismatch"
    print("KERNEL_OK")
</pallas_src>

<mosaic_0001>
module attributes {stable_mosaic.version = 11 : i64} {
  func.func @_instrumented_kernel(%arg0: i32, %arg1: i32, %arg2: memref<1x8x128xf32, #tpu.memory_space<vmem>>, %arg3: memref<8x8xf32, #tpu.memory_space<vmem>>, %arg4: memref<8x8xf32, #tpu.memory_space<vmem>>, %arg5: memref<8x4xf32, #tpu.memory_space<vmem>>, %arg6: memref<1x8x128xf32, #tpu.memory_space<vmem>>, %arg7: memref<1x8x128xf32, #tpu.memory_space<vmem>>) attributes {dimension_semantics = [#tpu.dimension_semantics<parallel>, #tpu.dimension_semantics<parallel>], iteration_bounds = array<i64: 2, 2>, scalar_prefetch = 0 : i64, scratch_operands = 0 : i64, tpu.core_type = #tpu.core_type<tc>, window_params = [{transform_indices = @transform_0, window_bounds = array<i64: 1, 8, 128>}, {pipeline_mode = #tpu.pipeline_mode<synchronous>, transform_indices = @transform_1, window_bounds = array<i64: 8, 8>}, {pipeline_mode = #tpu.pipeline_mode<synchronous>, transform_indices = @transform_2, window_bounds = array<i64: 8, 8>}, {pipeline_mode = #tpu.pipeline_mode<synchronous>, transform_indices = @transform_3, window_bounds = array<i64: 8, 4>}, {transform_indices = @transform_4, window_bounds = array<i64: 1, 8, 128>}, {transform_indices = @transform_5, window_bounds = array<i64: 1, 8, 128>}]} {
    %c0 = arith.constant 0 : index
    %c0_0 = arith.constant 0 : index
    %c0_1 = arith.constant 0 : index
    %0 = vector.load %arg2[%c0, %c0_0, %c0_1] : memref<1x8x128xf32, #tpu.memory_space<vmem>>, vector<1x8x128xf32>
    %1 = vector.shape_cast %0 : vector<1x8x128xf32> to vector<8x128xf32>
    %c0_2 = arith.constant 0 : index
    %c0_3 = arith.constant 0 : index
    %2 = vector.load %arg3[%c0_2, %c0_3] : memref<8x8xf32, #tpu.memory_space<vmem>>, vector<8x8xf32>
    %cst = arith.constant dense<0.000000e+00> : vector<8x128xf32>
    %3 = tpu.matmul %2, %1, %cst {dimension_numbers = #tpu.dot_dimension_numbers<[1], [0], [0], [1], [0, 0, 1, 1], [], []>} : vector<8x8xf32>, vector<8x128xf32>, vector<8x128xf32> -> vector<8x128xf32>
    %c0_4 = arith.constant 0 : index
    %c0_5 = arith.constant 0 : index
    %4 = vector.load %arg5[%c0_4, %c0_5] : memref<8x4xf32, #tpu.memory_space<vmem>>, vector<8x4xf32>
    %5 = vector.extract_strided_slice %4 {offsets = [0, 0], sizes = [8, 1], strides = [1, 1]} : vector<8x4xf32> to vector<8x1xf32>
    %6 = vector.extract_strided_slice %4 {offsets = [0, 1], sizes = [8, 1], strides = [1, 1]} : vector<8x4xf32> to vector<8x1xf32>
    %7 = vector.extract_strided_slice %4 {offsets = [0, 2], sizes = [8, 1], strides = [1, 1]} : vector<8x4xf32> to vector<8x1xf32>
    %8 = vector.extract_strided_slice %4 {offsets = [0, 3], sizes = [8, 1], strides = [1, 1]} : vector<8x4xf32> to vector<8x1xf32>
    %9 = vector.broadcast %5 : vector<8x1xf32> to vector<8x128xf32>
    %10 = arith.addf %3, %9 : vector<8x128xf32>
    %c0_6 = arith.constant 0 : index
    %c0_7 = arith.constant 0 : index
    %c0_8 = arith.constant 0 : index
    %11 = vector.load %arg6[%c0_6, %c0_7, %c0_8] : memref<1x8x128xf32, #tpu.memory_space<vmem>>, vector<1x8x128xf32>
    %12 = vector.shape_cast %11 : vector<1x8x128xf32> to vector<8x128xf32>
    %13 = vector.shape_cast %10 : vector<8x128xf32> to vector<1x8x128xf32>
    tpu.vector_store %arg6[%c0_6, %c0_7, %c0_8], %13 {strides = array<i32>} : memref<1x8x128xf32, #tpu.memory_space<vmem>>, vector<1x8x128xf32>,
    %14 = vector.broadcast %7 : vector<8x1xf32> to vector<8x128xf32>
    %15 = arith.mulf %10, %14 : vector<8x128xf32>
    %16 = vector.broadcast %8 : vector<8x1xf32> to vector<8x128xf32>
    %17 = arith.addf %15, %16 : vector<8x128xf32>
    %cst_9 = arith.constant 0.000000e+00 : f32
    %18 = vector.broadcast %cst_9 : f32 to vector<8x128xf32>
    %19 = arith.maximumf %17, %18 : vector<8x128xf32>
    %c0_10 = arith.constant 0 : index
    %c0_11 = arith.constant 0 : index
    %20 = vector.load %arg4[%c0_10, %c0_11] : memref<8x8xf32, #tpu.memory_space<vmem>>, vector<8x8xf32>
    %cst_12 = arith.constant dense<0.000000e+00> : vector<8x128xf32>
    %21 = tpu.matmul %20, %19, %cst_12 {dimension_numbers = #tpu.dot_dimension_numbers<[1], [0], [0], [1], [0, 0, 1, 1], [], []>} : vector<8x8xf32>, vector<8x128xf32>, vector<8x128xf32> -> vector<8x128xf32>
    %22 = vector.broadcast %6 : vector<8x1xf32> to vector<8x128xf32>
    %23 = arith.addf %21, %22 : vector<8x128xf32>
    %c0_13 = arith.constant 0 : index
    %c0_14 = arith.constant 0 : index
    %c0_15 = arith.constant 0 : index
    %24 = vector.load %arg7[%c0_13, %c0_14, %c0_15] : memref<1x8x128xf32, #tpu.memory_space<vmem>>, vector<1x8x128xf32>
    %25 = vector.shape_cast %24 : vector<1x8x128xf32> to vector<8x128xf32>
    %26 = vector.shape_cast %23 : vector<8x128xf32> to vector<1x8x128xf32>
    tpu.vector_store %arg7[%c0_13, %c0_14, %c0_15], %26 {strides = array<i32>} : memref<1x8x128xf32, #tpu.memory_space<vmem>>, vector<1x8x128xf32>,
    return
  }
  func.func @transform_0(%arg0: i32, %arg1: i32) -> (i32, i32, i32) {
    %c0_i32 = arith.constant 0 : i32
    %c0_i32_0 = arith.constant 0 : i32
    return %arg0, %c0_i32, %arg1 : i32, i32, i32
  }
  func.func @transform_1(%arg0: i32, %arg1: i32) -> (i32, i32) {
    %c0_i32 = arith.constant 0 : i32
    %c0_i32_0 = arith.constant 0 : i32
    %c0_i32_1 = arith.constant 0 : i32
    return %c0_i32, %c0_i32_0 : i32, i32
  }
  func.func @transform_2(%arg0: i32, %arg1: i32) -> (i32, i32) {
    %c0_i32 = arith.constant 0 : i32
    %c0_i32_0 = arith.constant 0 : i32
    %c0_i32_1 = arith.constant 0 : i32
    return %c0_i32, %c0_i32_0 : i32, i32
  }
  func.func @transform_3(%arg0: i32, %arg1: i32) -> (i32, i32) {
    %c0_i32 = arith.constant 0 : i32
    %c0_i32_0 = arith.constant 0 : i32
    %c0_i32_1 = arith.constant 0 : i32
    return %c0_i32, %c0_i32_0 : i32, i32
  }
  func.func @transform_4(%arg0: i32, %arg1: i32) -> (i32, i32, i32) {
    %c0_i32 = arith.constant 0 : i32
    %c0_i32_0 = arith.constant 0 : i32
    return %arg0, %c0_i32, %arg1 : i32, i32, i32
  }
  func.func @transform_5(%arg0: i32, %arg1: i32) -> (i32, i32, i32) {
    %c0_i32 = arith.constant 0 : i32
    %c0_i32_0 = arith.constant 0 : i32
    return %arg0, %c0_i32, %arg1 : i32, i32, i32
  }
}

</mosaic_0001>

<bundles_post_ra>
// kernel: instrumented_forward.1
= control target key start
LH: loop header
LB: loop body
LE: loop exit
PB: predicated region body
PF: predicated region fallthrough
CT: control target
= control target key end

     0   :  { %s739_s18 = smov 0   ;;  %s741_s19 = smov 0   ;;  %s809_s0 = inlined_call_operand.vmem [shape: f32[2,8,256], index: 0, kind: input, shape index: {}]   ;;  %s810_s1 = inlined_call_operand.vmem [shape: f32[8,8], index: 1, kind: input, shape index: {}]   ;;  %s811_s2 = inlined_call_operand.vmem [shape: f32[8,8], index: 2, kind: input, shape index: {}]   ;;  %s812_s3 = inlined_call_operand.vmem [shape: f32[8,4], index: 3, kind: input, shape index: {}]   ;;  %s813_s4 = inlined_call_operand.vmem [shape: f32[2,8,256], index: 4, kind: output, shape index: {0}]   ;;  %s814_s5 = inlined_call_operand.vmem [shape: f32[2,8,256], index: 5, kind: output, shape index: {1}]  }
   0x1   :  { %s743_s20 = smov 0   ;;  %s745_s21 = smov 0  }
   0x2   :  { %s747_s22 = smov 0  }
   0x3 LB: > { %s25_s23 = sadd.s32 1, %s693_s20  ;;  %s28_s24 = sadd.s32 1, %s697_s21  ;;  %s701_s22 = sphi %s747_s22, %s16_s22   ;;  %s697_s21 = sphi %s745_s21, %s818_s21   ;;  %s693_s20 = sphi %s743_s20, %s817_s20   ;;  %s689_s19 = sphi %s741_s19, %s816_s19   ;;  %s685_s18 = sphi %s739_s18, %s815_s18  }
   0x4   : > { %p26_p0 = scmp.ge.s32.totalorder %s25_s23, 2  ;;  %p587_p1 = scmp.ge.s32.totalorder %s701_s22, 1 }
   0x5   : > { %p211_p2 = scmp.lt.s32.totalorder %s701_s22, 5 }
   0x6   : > { %s820_s23 = smov (%p26_p0, %s25_s23), 0  ;;  %s822_s24 = smov (!%p26_p0, %s28_s24), %s697_s21 }
   0x7   : > { %p212_p3 = pnand %p587_p1, %p211_p2  ;;  %p30_p4 = scmp.ge.s32.totalorder %s822_s24, 2 }
   0x8   : > { %p253_p5 = scmp.lt.s32.totalorder (!%p212_p3), %s689_s19, 1  ;;  %p255_p6 = scmp.lt.s32.totalorder (!%p212_p3), %s685_s18, 1  ;;  %v703_v0 = vmov (!%p212_p3), 0.0   ;;  %vm704_vm0 = vmmov (!%p212_p3), 0   ;;  %v279_v1 = vld [vmem:[%s812_s3] sm:$0xff] (!%p212_p3)  ;;  %v705_v2 = vmov (!%p212_p3), 0  }
   0x9   : > { %s824_s24 = smov (%p30_p4, %s822_s24), 0  ;;  %215 = sbr.rel (%p212_p3) target bundleno = 459 (0x1cb), region = 36 }
   0xa   : > { %602 = vmatprep.subr.mxu0 (!%p212_p3), %v703_v0  ;;  %604 = vmatprep.mubr.msk.f32.mxu0 (!%p212_p3), %vm704_vm0, %v703_v0  ;;  %v706_v3 = vmov (!%p212_p3), 3   ;;  %v278_v4 = vld [vmem:[%s810_s1] sm:$0xff] (!%p212_p3)  ;;  %vm285_vm1 = vcmask (!%p212_p3), 64512   ;;  %v707_v5 = vmov (!%p212_p3), 2   ;;  %v708_v7 = vmov (!%p212_p3), 1  }
   0xb   : > { %658 = vset.pattern.permute.xlu0 (!%p212_p3), %v705_v2  ;;  %660 = vset.pattern.permute.xlu1 (!%p212_p3), %v706_v3  ;;  %v371_v17 = vld [vmem:[%s811_s2] sm:$0xff] (!%p212_p3) }
   0xc   : > { %282 = vperm.xlu0 (!%p212_p3), %658, %v279_v1   ;;  %366 = vperm.xlu1 (!%p212_p3), %660, %v279_v1  }
   0xd   : > { %607 = vmatprep.subr.mxu1 (!%p212_p3), %v703_v0  ;;  %609 = vmatprep.mubr.msk.f32.mxu1 (!%p212_p3), %vm704_vm0, %v703_v0 }
  0x10   : > { %s826_s19 = smov (!%p253_p5, %s689_s19), 1  ;;  %s828_s18 = smov (!%p255_p6, %s685_s18), 1  ;;  %659 = vset.pattern.permute.xlu0 %v707_v5  ;;  %661 = vset.pattern.permute.xlu1 %v708_v7 }
  0x11   : > { %s588_s27 = sshll.u32 %s826_s19, 1  ;;  %361 = vperm.xlu0 %659, %v279_v1   ;;  %373 = vperm.xlu1 %661, %v279_v1  }
  0x12   : > { %s258_s28 = sadd.s32 %s588_s27, %s828_s18 }
  0x13   : > { %s772_s29 = sshll.u32 %s258_s28, 3 }
  0x14   : > { %s260_s7 = scalar_lea.vmem %s809_s0, %s772_s29  ;;  %s268_s12 = scalar_lea.vmem %s813_s4, %s772_s29 }
  0x15   : > { %v277_v6 = vld [vmem:[%s260_s7] sm:$0xff]  ;;  %662 = vset.pattern.permute.xlu0 %v708_v7  ;;  %s276_s17 = scalar_lea.vmem %s814_s5, %s772_s29 }
  0x16   : > { %603 = vmatpush3.msra.mxu0 %v277_v6 }
  0x17   : > { %605 = vmatmul.mubr.msk.f32.vlgmr.msra.gmra.mrb[0].mxu0 %vm285_vm1, %v278_v4 }
  0x8b   : > { %v283_v8 = vpop.permute.xlu0 %282  ;;  %v367_v13 = vpop.permute.xlu1 %366 }
  0x90   : > { %v362_v10 = vpop.permute.xlu0 %361  ;;  %v374_v18 = vpop.permute.xlu1 %373 }
  0xea   : > { %v355_v9 = vpop.f32.mrb[0].mxu0 }
  0xeb   : > { %v356_v11 = vadd.f32 %v355_v9, %v283_v8  ;;  %v606_v12 = vpop.f32.mrb[1].mxu0 }
  0xed   : > { %359 = vst [vmem:[%s268_s12] sm:$0xff] %v356_v11  ;;  %v364_v14 = vmul.f32 %v362_v10, %v356_v11 }
  0xef   : > { %v369_v15 = vadd.f32 %v367_v13, %v364_v14 }
  0xf1   : > { %v370_v16 = vmax.f32 %v369_v15, 0.0 }
  0xf3   : > { %608 = vmatpush3.msra.mxu1 %v370_v16 }
  0xf4   : > { %610 = vmatmul.mubr.msk.f32.vlgmr.msra.gmra.mrb[0].mxu1 %vm285_vm1, %v371_v17 }
 0x1c7   : > { %v445_v19 = vpop.f32.mrb[0].mxu1 }
 0x1c8   : > { %v446_v20 = vadd.f32 %v445_v19, %v374_v18  ;;  %v611_v21 = vpop.f32.mrb[1].mxu1 }
 0x1ca   : > { %449 = vst [vmem:[%s276_s17] sm:$0xff] %v446_v20 }
 0x1cb PF: > { %s16_s22 = sadd.s32 1, %s701_s22   ;;  %s815_s18 = smov %s693_s20 }
 0x1cc   : > { %p13_p7 = scmp.ge.s32.totalorder %s16_s22, 6   ;;  %s816_s19 = smov %s697_s21 }
 0x1cd   : > { %s817_s20 = smov %s820_s23  ;;  %s818_s21 = smov %s824_s24 }
 0x1ce   :  { %15 = sbr.rel (!%p13_p7) target bundleno = 3 (0x3), region = 78 }

</bundles_post_ra>
